<compile_context>
chip_gen: v7x
topology: tpu7x:2x2x1
jax: 0.10.0
libtpu: 0.0.40
codegen_flags: <defaults>
</compile_context>

<pallas_src>
import jax
import jax.numpy as jnp
from jax.experimental import pallas as pl
from jax.experimental.pallas import tpu as pltpu


def _round_up(x, m):
    return ((x + m - 1) // m) * m


def _partial_decoder_kernel(fembT_ref, fbiasT_ref, zT_ref, wzT_ref, bzT_ref,
                            w1zT_ref, w1fT_ref, w1bT_ref, b1T_ref, w2_ref,
                            b2_ref, out_ref):
    B_pad = zT_ref.shape[1]

    # ---- per-batch work (tiny matmuls; recomputed per O tile so the grid axis
    #      can be "parallel" — the MXU slot has plenty of slack) --------------
    # z_processor: ReLU(z @ Wz + bz), computed transposed as (H, B) so H sits on
    # sublanes and the batch never touches the lane axis.
    pzT = jnp.maximum(
        jnp.dot(wzT_ref[...], zT_ref[...], preferred_element_type=jnp.float32)
        + bzT_ref[...], 0.0)                                           # (H, B)
    # batch slice of the first j_layer Linear: (H, B)
    partzT = jnp.dot(w1zT_ref[...], pzT, preferred_element_type=jnp.float32)

    # ---- per-feature work for this O tile, laid out (H, To): O on lanes -----
    part_fT = (jnp.dot(w1fT_ref[...], fembT_ref[...],
                       preferred_element_type=jnp.float32)             # MXU
               + w1bT_ref[...] * fbiasT_ref[...]                       # (H,1)*(1,To)
               + b1T_ref[...])                                         # (H, To)

    w2_row = w2_ref[...]                                               # (1, H)
    b2 = b2_ref[...]                                                   # (1, 1)
    lane_ids = jax.lax.broadcasted_iota(jnp.int32, (1, B_pad), 1)

    def body(b, carry):
        # Extract batch column b of partzT as (H, 1) via a one-hot lane reduce:
        # keeps everything 2-D (no transposes / dynamic lane slices in the loop).
        sel = (lane_ids == b).astype(jnp.float32)                      # (1, B)
        pcol = jnp.sum(partzT * sel, axis=1, keepdims=True)            # (H, 1)
        # Fused first j_layer Linear + ReLU for batch b over this O tile (VPU).
        slab = jnp.maximum(pcol + part_fT, 0.0)                        # (H, To)
        # Second j_layer Linear (H -> 1) as an MXU dot over the sublane H axis;
        # the result is a lane-dense (1, To) row -> full unmasked store.
        row = jnp.dot(w2_row, slab, preferred_element_type=jnp.float32)
        out_ref[pl.ds(b, 1), :] = row + b2
        return carry

    jax.lax.fori_loop(0, B_pad, body, 0, unroll=min(8, B_pad))


def partial_decoder_forward(z, params, feature_embedding, feature_bias, *,
                            o_tile=128, femb_dtype=jnp.float32,
                            vmem_limit_bytes=None):
    """Pallas-backed PartialDecoder forward. Returns (batch, output_dim).

    o_tile: lane-tile over output_dim (multiple of 128). femb_dtype=jnp.bfloat16
    halves the streamed feature_embedding HBM traffic at large output_dim.
    vmem_limit_bytes: raise the scoped VMEM limit (useful on v5e for big tiles).
    """
    B, L = z.shape
    O, C = feature_embedding.shape
    H = params["wz"].shape[1]
    assert o_tile % 128 == 0

    f32 = jnp.float32
    B_pad = _round_up(B, 8)
    O_pad = _round_up(O, o_tile)

    # Transposed / padded operands: O (and batch) live on the lane axis of their
    # own arrays, H lives on sublanes inside the kernel.
    zT = jnp.zeros((L, B_pad), f32).at[:, :B].set(z.astype(f32).T)
    fembT = jnp.zeros((C, O_pad), femb_dtype).at[:, :O].set(
        feature_embedding.astype(femb_dtype).T)
    fbiasT = jnp.zeros((1, O_pad), f32).at[:, :O].set(feature_bias.astype(f32).T)

    wzT = params["wz"].astype(f32).T            # (H, L)
    bzT = params["bz"].astype(f32).T            # (H, 1)
    w1zT = params["w1z"].astype(f32).T          # (H, H)
    w1fT = params["w1f"].astype(femb_dtype).T   # (H, C)
    w1bT = params["w1b"].astype(f32).T          # (H, 1)
    b1T = params["b1"].astype(f32).T            # (H, 1)
    w2 = params["w2"].astype(f32)               # (1, H)
    b2 = params["b2"].astype(f32).reshape(1, 1)

    grid = (O_pad // o_tile,)
    const2 = lambda o: (0, 0)

    in_specs = [
        pl.BlockSpec((C, o_tile), lambda o: (0, o)),   # fembT  (streamed over O)
        pl.BlockSpec((1, o_tile), lambda o: (0, o)),   # fbiasT (streamed over O)
        pl.BlockSpec((L, B_pad), const2),              # zT     (resident)
        pl.BlockSpec((H, L), const2),                  # wzT
        pl.BlockSpec((H, 1), const2),                  # bzT
        pl.BlockSpec((H, H), const2),                  # w1zT
        pl.BlockSpec((H, C), const2),                  # w1fT
        pl.BlockSpec((H, 1), const2),                  # w1bT
        pl.BlockSpec((H, 1), const2),                  # b1T
        pl.BlockSpec((1, H), const2),                  # w2
        pl.BlockSpec((1, 1), const2),                  # b2
    ]
    out_spec = pl.BlockSpec((B_pad, o_tile), lambda o: (0, o))

    cp = dict(dimension_semantics=("parallel",))       # v7x: shard O tiles on 2 TCs
    if vmem_limit_bytes is not None:
        cp["vmem_limit_bytes"] = vmem_limit_bytes

    out_pad = pl.pallas_call(
        _partial_decoder_kernel,
        out_shape=jax.ShapeDtypeStruct((B_pad, O_pad), f32),
        grid=grid,
        in_specs=in_specs,
        out_specs=out_spec,
        compiler_params=pltpu.CompilerParams(**cp),
    )(fembT, fbiasT, zT, wzT, bzT, w1zT, w1bT if False else w1fT, w1bT, b1T, w2, b2)

    return out_pad[:B, :O]


def reference_forward(z, params, feature_embedding, feature_bias):
    """Pure-JAX mirror of the PyTorch module (concat formulation) for validation."""
    B = z.shape[0]
    O, C = feature_embedding.shape
    pz = jax.nn.relu(z @ params["wz"] + params["bz"])                            # (B, H)
    H = pz.shape[-1]
    pz_e = jnp.broadcast_to(pz[:, None, :], (B, O, H))
    F_e = jnp.broadcast_to(feature_embedding[None], (B, O, C))
    b_e = jnp.broadcast_to(feature_bias[None], (B, O, 1))
    j_in = jnp.concatenate([pz_e, F_e, b_e], axis=2).reshape(B * O, -1)
    W1 = jnp.concatenate([params["w1z"], params["w1f"], params["w1b"]], axis=0)  # (H+C+1, H)
    h = jax.nn.relu(j_in @ W1 + params["b1"])
    out = h @ params["w2"].T + params["b2"]                                      # (B*O, 1)
    return out.reshape(B, O)


def init_params(key, latent_dim, hidden_dim, code_dim):
    ks = jax.random.split(key, 8)
    s = 0.1
    return {
        # z_processor Linear(latent_dim -> hidden_dim), stored (in, out)
        "wz": s * jax.random.normal(ks[0], (latent_dim, hidden_dim), jnp.float32),
        "bz": s * jax.random.normal(ks[1], (1, hidden_dim), jnp.float32),
        # j_layer Linear(hidden+code+1 -> hidden), split by input block, stored (in, out)
        "w1z": s * jax.random.normal(ks[2], (hidden_dim, hidden_dim), jnp.float32),
        "w1f": s * jax.random.normal(ks[3], (code_dim, hidden_dim), jnp.float32),
        "w1b": s * jax.random.normal(ks[4], (1, hidden_dim), jnp.float32),
        "b1": s * jax.random.normal(ks[5], (1, hidden_dim), jnp.float32),
        # j_layer Linear(hidden -> 1): PyTorch-style (out, in) row
        "w2": s * jax.random.normal(ks[6], (1, hidden_dim), jnp.float32),
        "b2": s * jax.random.normal(ks[7], (1,), jnp.float32),
    }


if __name__ == "__main__":
    # Small shapes consistent with the module.
    batch, latent_dim, decoder_hidden_dim, output_dim, code_dim = 2, 8, 32, 16, 4
    root = jax.random.PRNGKey(0)
    k_z, k_f, k_b, k_p = jax.random.split(root, 4)
    z = jax.random.normal(k_z, (batch, latent_dim), jnp.float32)
    femb = jax.random.normal(k_f, (output_dim, code_dim), jnp.float32)
    fbias = jax.random.normal(k_b, (output_dim, 1), jnp.float32)
    params = init_params(k_p, latent_dim, decoder_hidden_dim, code_dim)

    fwd = jax.jit(partial_decoder_forward)
    out = jax.block_until_ready(fwd(z, params, femb, fbias))
    ref = reference_forward(z, params, femb, fbias)
    assert out.shape == (batch, output_dim), out.shape
    assert jnp.allclose(out, ref, atol=1e-4, rtol=1e-3), (out, ref)

    # Second check: multi-tile grid + padding path (O spans 3 lane tiles, B padded).
    b2_, l2, h2, o2, c2 = 5, 12, 64, 300, 6
    ks = jax.random.split(jax.random.PRNGKey(1), 4)
    z2 = jax.random.normal(ks[0], (b2_, l2), jnp.float32)
    femb2 = jax.random.normal(ks[1], (o2, c2), jnp.float32)
    fbias2 = jax.random.normal(ks[2], (o2, 1), jnp.float32)
    params2 = init_params(ks[3], l2, h2, c2)
    out2 = jax.block_until_ready(fwd(z2, params2, femb2, fbias2))
    ref2 = reference_forward(z2, params2, femb2, fbias2)
    assert out2.shape == (b2_, o2), out2.shape
    assert jnp.allclose(out2, ref2, atol=1e-4, rtol=1e-3), float(
        jnp.max(jnp.abs(out2 - ref2)))

    print("KERNEL_OK")
</pallas_src>

<mosaic_0001>
module attributes {stable_mosaic.version = 11 : i64} {
  func.func @_partial_decoder_kernel(%arg0: i32, %arg1: memref<4x128xf32, #tpu.memory_space<vmem>>, %arg2: memref<1x128xf32, #tpu.memory_space<vmem>>, %arg3: memref<8x8xf32, #tpu.memory_space<vmem>>, %arg4: memref<32x8xf32, #tpu.memory_space<vmem>>, %arg5: memref<32x1xf32, #tpu.memory_space<vmem>>, %arg6: memref<32x32xf32, #tpu.memory_space<vmem>>, %arg7: memref<32x4xf32, #tpu.memory_space<vmem>>, %arg8: memref<32x1xf32, #tpu.memory_space<vmem>>, %arg9: memref<32x1xf32, #tpu.memory_space<vmem>>, %arg10: memref<1x32xf32, #tpu.memory_space<vmem>>, %arg11: memref<1x1xf32, #tpu.memory_space<vmem>>, %arg12: memref<8x128xf32, #tpu.memory_space<vmem>>) attributes {dimension_semantics = [#tpu.dimension_semantics<parallel>], iteration_bounds = array<i64: 1>, scalar_prefetch = 0 : i64, scratch_operands = 0 : i64, tpu.core_type = #tpu.core_type<tc>, window_params = [{transform_indices = @transform_0, window_bounds = array<i64: 4, 128>}, {transform_indices = @transform_1, window_bounds = array<i64: 1, 128>}, {pipeline_mode = #tpu.pipeline_mode<synchronous>, transform_indices = @transform_2, window_bounds = array<i64: 8, 8>}, {pipeline_mode = #tpu.pipeline_mode<synchronous>, transform_indices = @transform_3, window_bounds = array<i64: 32, 8>}, {pipeline_mode = #tpu.pipeline_mode<synchronous>, transform_indices = @transform_4, window_bounds = array<i64: 32, 1>}, {pipeline_mode = #tpu.pipeline_mode<synchronous>, transform_indices = @transform_5, window_bounds = array<i64: 32, 32>}, {pipeline_mode = #tpu.pipeline_mode<synchronous>, transform_indices = @transform_6, window_bounds = array<i64: 32, 4>}, {pipeline_mode = #tpu.pipeline_mode<synchronous>, transform_indices = @transform_7, window_bounds = array<i64: 32, 1>}, {pipeline_mode = #tpu.pipeline_mode<synchronous>, transform_indices = @transform_8, window_bounds = array<i64: 32, 1>}, {pipeline_mode = #tpu.pipeline_mode<synchronous>, transform_indices = @transform_9, window_bounds = array<i64: 1, 32>}, {pipeline_mode = #tpu.pipeline_mode<synchronous>, transform_indices = @transform_10, window_bounds = array<i64: 1, 1>}, {transform_indices = @transform_11, window_bounds = array<i64: 8, 128>}]} {
    %c0 = arith.constant 0 : index
    %c0_0 = arith.constant 0 : index
    %0 = vector.load %arg4[%c0, %c0_0] : memref<32x8xf32, #tpu.memory_space<vmem>>, vector<32x8xf32>
    %c0_1 = arith.constant 0 : index
    %c0_2 = arith.constant 0 : index
    %1 = vector.load %arg3[%c0_1, %c0_2] : memref<8x8xf32, #tpu.memory_space<vmem>>, vector<8x8xf32>
    %cst = arith.constant dense<0.000000e+00> : vector<32x8xf32>
    %2 = tpu.matmul %0, %1, %cst {dimension_numbers = #tpu.dot_dimension_numbers<[1], [0], [0], [1], [0, 0, 1, 1], [], []>} : vector<32x8xf32>, vector<8x8xf32>, vector<32x8xf32> -> vector<32x8xf32>
    %c0_3 = arith.constant 0 : index
    %c0_4 = arith.constant 0 : index
    %3 = vector.load %arg5[%c0_3, %c0_4] : memref<32x1xf32, #tpu.memory_space<vmem>>, vector<32x1xf32>
    %4 = vector.broadcast %3 : vector<32x1xf32> to vector<32x8xf32>
    %5 = arith.addf %2, %4 : vector<32x8xf32>
    %cst_5 = arith.constant 0.000000e+00 : f32
    %6 = vector.broadcast %cst_5 : f32 to vector<32x8xf32>
    %7 = arith.maximumf %5, %6 : vector<32x8xf32>
    %c0_6 = arith.constant 0 : index
    %c0_7 = arith.constant 0 : index
    %8 = vector.load %arg6[%c0_6, %c0_7] : memref<32x32xf32, #tpu.memory_space<vmem>>, vector<32x32xf32>
    %cst_8 = arith.constant dense<0.000000e+00> : vector<32x8xf32>
    %9 = tpu.matmul %8, %7, %cst_8 {dimension_numbers = #tpu.dot_dimension_numbers<[1], [0], [0], [1], [0, 0, 1, 1], [], []>} : vector<32x32xf32>, vector<32x8xf32>, vector<32x8xf32> -> vector<32x8xf32>
    %c0_9 = arith.constant 0 : index
    %c0_10 = arith.constant 0 : index
    %10 = vector.load %arg7[%c0_9, %c0_10] : memref<32x4xf32, #tpu.memory_space<vmem>>, vector<32x4xf32>
    %c0_11 = arith.constant 0 : index
    %c0_12 = arith.constant 0 : index
    %11 = vector.load %arg1[%c0_11, %c0_12] : memref<4x128xf32, #tpu.memory_space<vmem>>, vector<4x128xf32>
    %cst_13 = arith.constant dense<0.000000e+00> : vector<32x128xf32>
    %12 = tpu.matmul %10, %11, %cst_13 {dimension_numbers = #tpu.dot_dimension_numbers<[1], [0], [0], [1], [0, 0, 1, 1], [], []>} : vector<32x4xf32>, vector<4x128xf32>, vector<32x128xf32> -> vector<32x128xf32>
    %c0_14 = arith.constant 0 : index
    %c0_15 = arith.constant 0 : index
    %13 = vector.load %arg8[%c0_14, %c0_15] : memref<32x1xf32, #tpu.memory_space<vmem>>, vector<32x1xf32>
    %c0_16 = arith.constant 0 : index
    %c0_17 = arith.constant 0 : index
    %14 = vector.load %arg2[%c0_16, %c0_17] : memref<1x128xf32, #tpu.memory_space<vmem>>, vector<1x128xf32>
    %15 = vector.broadcast %13 : vector<32x1xf32> to vector<32x128xf32>
    %16 = vector.broadcast %14 : vector<1x128xf32> to vector<32x128xf32>
    %17 = arith.mulf %15, %16 : vector<32x128xf32>
    %18 = arith.addf %12, %17 : vector<32x128xf32>
    %c0_18 = arith.constant 0 : index
    %c0_19 = arith.constant 0 : index
    %19 = vector.load %arg9[%c0_18, %c0_19] : memref<32x1xf32, #tpu.memory_space<vmem>>, vector<32x1xf32>
    %20 = vector.broadcast %19 : vector<32x1xf32> to vector<32x128xf32>
    %21 = arith.addf %18, %20 : vector<32x128xf32>
    %c0_20 = arith.constant 0 : index
    %c0_21 = arith.constant 0 : index
    %22 = vector.load %arg10[%c0_20, %c0_21] : memref<1x32xf32, #tpu.memory_space<vmem>>, vector<1x32xf32>
    %c0_22 = arith.constant 0 : index
    %c0_23 = arith.constant 0 : index
    %23 = vector.load %arg11[%c0_22, %c0_23] : memref<1x1xf32, #tpu.memory_space<vmem>>, vector<1x1xf32>
    %24 = tpu.iota {dimensions = array<i32: 1>} : vector<1x8xi32>
    %c0_i32 = arith.constant 0 : i32
    %25 = vector.broadcast %c0_i32 : i32 to vector<1x8xi32>
    %26 = arith.cmpi eq, %24, %25 : vector<1x8xi32>
    %27 = arith.extui %26 : vector<1x8xi1> to vector<1x8xi32>
    %28 = arith.sitofp %27 : vector<1x8xi32> to vector<1x8xf32>
    %29 = vector.broadcast %28 : vector<1x8xf32> to vector<32x8xf32>
    %30 = arith.mulf %9, %29 : vector<32x8xf32>
    %cst_24 = arith.constant dense<0.000000e+00> : vector<32xf32>
    %31 = vector.multi_reduction <add>, %30, %cst_24 [1] : vector<32x8xf32> to vector<32xf32>
    %32 = vector.shape_cast %31 : vector<32xf32> to vector<32x1xf32>
    %33 = vector.broadcast %32 : vector<32x1xf32> to vector<32x128xf32>
    %34 = arith.addf %33, %21 : vector<32x128xf32>
    %cst_25 = arith.constant 0.000000e+00 : f32
    %35 = vector.broadcast %cst_25 : f32 to vector<32x128xf32>
    %36 = arith.maximumf %34, %35 : vector<32x128xf32>
    %cst_26 = arith.constant dense<0.000000e+00> : vector<1x128xf32>
    %37 = tpu.matmul %22, %36, %cst_26 {dimension_numbers = #tpu.dot_dimension_numbers<[1], [0], [0], [1], [0, 0, 1, 1], [], []>} : vector<1x32xf32>, vector<32x128xf32>, vector<1x128xf32> -> vector<1x128xf32>
    %38 = vector.broadcast %23 : vector<1x1xf32> to vector<1x128xf32>
    %39 = arith.addf %37, %38 : vector<1x128xf32>
    %40 = arith.index_cast %c0_i32 : i32 to index
    %c0_27 = arith.constant 0 : index
    %41 = vector.load %arg12[%40, %c0_27] : memref<8x128xf32, #tpu.memory_space<vmem>>, vector<1x128xf32>
    tpu.vector_store %arg12[%40, %c0_27], %39 {strides = array<i32>} : memref<8x128xf32, #tpu.memory_space<vmem>>, vector<1x128xf32>,
    %c1_i32 = arith.constant 1 : i32
    %42 = vector.broadcast %c1_i32 : i32 to vector<1x8xi32>
    %43 = arith.cmpi eq, %24, %42 : vector<1x8xi32>
    %44 = arith.extui %43 : vector<1x8xi1> to vector<1x8xi32>
    %45 = arith.sitofp %44 : vector<1x8xi32> to vector<1x8xf32>
    %46 = vector.broadcast %45 : vector<1x8xf32> to vector<32x8xf32>
    %47 = arith.mulf %9, %46 : vector<32x8xf32>
    %cst_28 = arith.constant dense<0.000000e+00> : vector<32xf32>
    %48 = vector.multi_reduction <add>, %47, %cst_28 [1] : vector<32x8xf32> to vector<32xf32>
    %49 = vector.shape_cast %48 : vector<32xf32> to vector<32x1xf32>
    %50 = vector.broadcast %49 : vector<32x1xf32> to vector<32x128xf32>
    %51 = arith.addf %50, %21 : vector<32x128xf32>
    %cst_29 = arith.constant 0.000000e+00 : f32
    %52 = vector.broadcast %cst_29 : f32 to vector<32x128xf32>
    %53 = arith.maximumf %51, %52 : vector<32x128xf32>
    %cst_30 = arith.constant dense<0.000000e+00> : vector<1x128xf32>
    %54 = tpu.matmul %22, %53, %cst_30 {dimension_numbers = #tpu.dot_dimension_numbers<[1], [0], [0], [1], [0, 0, 1, 1], [], []>} : vector<1x32xf32>, vector<32x128xf32>, vector<1x128xf32> -> vector<1x128xf32>
    %55 = vector.broadcast %23 : vector<1x1xf32> to vector<1x128xf32>
    %56 = arith.addf %54, %55 : vector<1x128xf32>
    %57 = arith.index_cast %c1_i32 : i32 to index
    %c0_31 = arith.constant 0 : index
    %58 = vector.load %arg12[%57, %c0_31] : memref<8x128xf32, #tpu.memory_space<vmem>>, vector<1x128xf32>
    tpu.vector_store %arg12[%57, %c0_31], %56 {strides = array<i32>} : memref<8x128xf32, #tpu.memory_space<vmem>>, vector<1x128xf32>,
    %c2_i32 = arith.constant 2 : i32
    %59 = vector.broadcast %c2_i32 : i32 to vector<1x8xi32>
    %60 = arith.cmpi eq, %24, %59 : vector<1x8xi32>
    %61 = arith.extui %60 : vector<1x8xi1> to vector<1x8xi32>
    %62 = arith.sitofp %61 : vector<1x8xi32> to vector<1x8xf32>
    %63 = vector.broadcast %62 : vector<1x8xf32> to vector<32x8xf32>
    %64 = arith.mulf %9, %63 : vector<32x8xf32>
    %cst_32 = arith.constant dense<0.000000e+00> : vector<32xf32>
    %65 = vector.multi_reduction <add>, %64, %cst_32 [1] : vector<32x8xf32> to vector<32xf32>
    %66 = vector.shape_cast %65 : vector<32xf32> to vector<32x1xf32>
    %67 = vector.broadcast %66 : vector<32x1xf32> to vector<32x128xf32>
    %68 = arith.addf %67, %21 : vector<32x128xf32>
    %cst_33 = arith.constant 0.000000e+00 : f32
    %69 = vector.broadcast %cst_33 : f32 to vector<32x128xf32>
    %70 = arith.maximumf %68, %69 : vector<32x128xf32>
    %cst_34 = arith.constant dense<0.000000e+00> : vector<1x128xf32>
    %71 = tpu.matmul %22, %70, %cst_34 {dimension_numbers = #tpu.dot_dimension_numbers<[1], [0], [0], [1], [0, 0, 1, 1], [], []>} : vector<1x32xf32>, vector<32x128xf32>, vector<1x128xf32> -> vector<1x128xf32>
    %72 = vector.broadcast %23 : vector<1x1xf32> to vector<1x128xf32>
    %73 = arith.addf %71, %72 : vector<1x128xf32>
    %74 = arith.index_cast %c2_i32 : i32 to index
    %c0_35 = arith.constant 0 : index
    %75 = vector.load %arg12[%74, %c0_35] : memref<8x128xf32, #tpu.memory_space<vmem>>, vector<1x128xf32>
    tpu.vector_store %arg12[%74, %c0_35], %73 {strides = array<i32>} : memref<8x128xf32, #tpu.memory_space<vmem>>, vector<1x128xf32>,
    %c3_i32 = arith.constant 3 : i32
    %76 = vector.broadcast %c3_i32 : i32 to vector<1x8xi32>
    %77 = arith.cmpi eq, %24, %76 : vector<1x8xi32>
    %78 = arith.extui %77 : vector<1x8xi1> to vector<1x8xi32>
    %79 = arith.sitofp %78 : vector<1x8xi32> to vector<1x8xf32>
    %80 = vector.broadcast %79 : vector<1x8xf32> to vector<32x8xf32>
    %81 = arith.mulf %9, %80 : vector<32x8xf32>
    %cst_36 = arith.constant dense<0.000000e+00> : vector<32xf32>
    %82 = vector.multi_reduction <add>, %81, %cst_36 [1] : vector<32x8xf32> to vector<32xf32>
    %83 = vector.shape_cast %82 : vector<32xf32> to vector<32x1xf32>
    %84 = vector.broadcast %83 : vector<32x1xf32> to vector<32x128xf32>
    %85 = arith.addf %84, %21 : vector<32x128xf32>
    %cst_37 = arith.constant 0.000000e+00 : f32
    %86 = vector.broadcast %cst_37 : f32 to vector<32x128xf32>
    %87 = arith.maximumf %85, %86 : vector<32x128xf32>
    %cst_38 = arith.constant dense<0.000000e+00> : vector<1x128xf32>
    %88 = tpu.matmul %22, %87, %cst_38 {dimension_numbers = #tpu.dot_dimension_numbers<[1], [0], [0], [1], [0, 0, 1, 1], [], []>} : vector<1x32xf32>, vector<32x128xf32>, vector<1x128xf32> -> vector<1x128xf32>
    %89 = vector.broadcast %23 : vector<1x1xf32> to vector<1x128xf32>
    %90 = arith.addf %88, %89 : vector<1x128xf32>
    %91 = arith.index_cast %c3_i32 : i32 to index
    %c0_39 = arith.constant 0 : index
    %92 = vector.load %arg12[%91, %c0_39] : memref<8x128xf32, #tpu.memory_space<vmem>>, vector<1x128xf32>
    tpu.vector_store %arg12[%91, %c0_39], %90 {strides = array<i32>} : memref<8x128xf32, #tpu.memory_space<vmem>>, vector<1x128xf32>,
    %c4_i32 = arith.constant 4 : i32
    %93 = vector.broadcast %c4_i32 : i32 to vector<1x8xi32>
    %94 = arith.cmpi eq, %24, %93 : vector<1x8xi32>
    %95 = arith.extui %94 : vector<1x8xi1> to vector<1x8xi32>
    %96 = arith.sitofp %95 : vector<1x8xi32> to vector<1x8xf32>
    %97 = vector.broadcast %96 : vector<1x8xf32> to vector<32x8xf32>
    %98 = arith.mulf %9, %97 : vector<32x8xf32>
    %cst_40 = arith.constant dense<0.000000e+00> : vector<32xf32>
    %99 = vector.multi_reduction <add>, %98, %cst_40 [1] : vector<32x8xf32> to vector<32xf32>
    %100 = vector.shape_cast %99 : vector<32xf32> to vector<32x1xf32>
    %101 = vector.broadcast %100 : vector<32x1xf32> to vector<32x128xf32>
    %102 = arith.addf %101, %21 : vector<32x128xf32>
    %cst_41 = arith.constant 0.000000e+00 : f32
    %103 = vector.broadcast %cst_41 : f32 to vector<32x128xf32>
    %104 = arith.maximumf %102, %103 : vector<32x128xf32>
    %cst_42 = arith.constant dense<0.000000e+00> : vector<1x128xf32>
    %105 = tpu.matmul %22, %104, %cst_42 {dimension_numbers = #tpu.dot_dimension_numbers<[1], [0], [0], [1], [0, 0, 1, 1], [], []>} : vector<1x32xf32>, vector<32x128xf32>, vector<1x128xf32> -> vector<1x128xf32>
    %106 = vector.broadcast %23 : vector<1x1xf32> to vector<1x128xf32>
    %107 = arith.addf %105, %106 : vector<1x128xf32>
    %108 = arith.index_cast %c4_i32 : i32 to index
    %c0_43 = arith.constant 0 : index
    %109 = vector.load %arg12[%108, %c0_43] : memref<8x128xf32, #tpu.memory_space<vmem>>, vector<1x128xf32>
    tpu.vector_store %arg12[%108, %c0_43], %107 {strides = array<i32>} : memref<8x128xf32, #tpu.memory_space<vmem>>, vector<1x128xf32>,
    %c5_i32 = arith.constant 5 : i32
    %110 = vector.broadcast %c5_i32 : i32 to vector<1x8xi32>
    %111 = arith.cmpi eq, %24, %110 : vector<1x8xi32>
    %112 = arith.extui %111 : vector<1x8xi1> to vector<1x8xi32>
    %113 = arith.sitofp %112 : vector<1x8xi32> to vector<1x8xf32>
    %114 = vector.broadcast %113 : vector<1x8xf32> to vector<32x8xf32>
    %115 = arith.mulf %9, %114 : vector<32x8xf32>
    %cst_44 = arith.constant dense<0.000000e+00> : vector<32xf32>
    %116 = vector.multi_reduction <add>, %115, %cst_44 [1] : vector<32x8xf32> to vector<32xf32>
    %117 = vector.shape_cast %116 : vector<32xf32> to vector<32x1xf32>
    %118 = vector.broadcast %117 : vector<32x1xf32> to vector<32x128xf32>
    %119 = arith.addf %118, %21 : vector<32x128xf32>
    %cst_45 = arith.constant 0.000000e+00 : f32
    %120 = vector.broadcast %cst_45 : f32 to vector<32x128xf32>
    %121 = arith.maximumf %119, %120 : vector<32x128xf32>
    %cst_46 = arith.constant dense<0.000000e+00> : vector<1x128xf32>
    %122 = tpu.matmul %22, %121, %cst_46 {dimension_numbers = #tpu.dot_dimension_numbers<[1], [0], [0], [1], [0, 0, 1, 1], [], []>} : vector<1x32xf32>, vector<32x128xf32>, vector<1x128xf32> -> vector<1x128xf32>
    %123 = vector.broadcast %23 : vector<1x1xf32> to vector<1x128xf32>
    %124 = arith.addf %122, %123 : vector<1x128xf32>
    %125 = arith.index_cast %c5_i32 : i32 to index
    %c0_47 = arith.constant 0 : index
    %126 = vector.load %arg12[%125, %c0_47] : memref<8x128xf32, #tpu.memory_space<vmem>>, vector<1x128xf32>
    tpu.vector_store %arg12[%125, %c0_47], %124 {strides = array<i32>} : memref<8x128xf32, #tpu.memory_space<vmem>>, vector<1x128xf32>,
    %c6_i32 = arith.constant 6 : i32
    %127 = vector.broadcast %c6_i32 : i32 to vector<1x8xi32>
    %128 = arith.cmpi eq, %24, %127 : vector<1x8xi32>
    %129 = arith.extui %128 : vector<1x8xi1> to vector<1x8xi32>
    %130 = arith.sitofp %129 : vector<1x8xi32> to vector<1x8xf32>
    %131 = vector.broadcast %130 : vector<1x8xf32> to vector<32x8xf32>
    %132 = arith.mulf %9, %131 : vector<32x8xf32>
    %cst_48 = arith.constant dense<0.000000e+00> : vector<32xf32>
    %133 = vector.multi_reduction <add>, %132, %cst_48 [1] : vector<32x8xf32> to vector<32xf32>
    %134 = vector.shape_cast %133 : vector<32xf32> to vector<32x1xf32>
    %135 = vector.broadcast %134 : vector<32x1xf32> to vector<32x128xf32>
    %136 = arith.addf %135, %21 : vector<32x128xf32>
    %cst_49 = arith.constant 0.000000e+00 : f32
    %137 = vector.broadcast %cst_49 : f32 to vector<32x128xf32>
    %138 = arith.maximumf %136, %137 : vector<32x128xf32>
    %cst_50 = arith.constant dense<0.000000e+00> : vector<1x128xf32>
    %139 = tpu.matmul %22, %138, %cst_50 {dimension_numbers = #tpu.dot_dimension_numbers<[1], [0], [0], [1], [0, 0, 1, 1], [], []>} : vector<1x32xf32>, vector<32x128xf32>, vector<1x128xf32> -> vector<1x128xf32>
    %140 = vector.broadcast %23 : vector<1x1xf32> to vector<1x128xf32>
    %141 = arith.addf %139, %140 : vector<1x128xf32>
    %142 = arith.index_cast %c6_i32 : i32 to index
    %c0_51 = arith.constant 0 : index
    %143 = vector.load %arg12[%142, %c0_51] : memref<8x128xf32, #tpu.memory_space<vmem>>, vector<1x128xf32>
    tpu.vector_store %arg12[%142, %c0_51], %141 {strides = array<i32>} : memref<8x128xf32, #tpu.memory_space<vmem>>, vector<1x128xf32>,
    %c7_i32 = arith.constant 7 : i32
    %144 = vector.broadcast %c7_i32 : i32 to vector<1x8xi32>
    %145 = arith.cmpi eq, %24, %144 : vector<1x8xi32>
    %146 = arith.extui %145 : vector<1x8xi1> to vector<1x8xi32>
    %147 = arith.sitofp %146 : vector<1x8xi32> to vector<1x8xf32>
    %148 = vector.broadcast %147 : vector<1x8xf32> to vector<32x8xf32>
    %149 = arith.mulf %9, %148 : vector<32x8xf32>
    %cst_52 = arith.constant dense<0.000000e+00> : vector<32xf32>
    %150 = vector.multi_reduction <add>, %149, %cst_52 [1] : vector<32x8xf32> to vector<32xf32>
    %151 = vector.shape_cast %150 : vector<32xf32> to vector<32x1xf32>
    %152 = vector.broadcast %151 : vector<32x1xf32> to vector<32x128xf32>
    %153 = arith.addf %152, %21 : vector<32x128xf32>
    %cst_53 = arith.constant 0.000000e+00 : f32
    %154 = vector.broadcast %cst_53 : f32 to vector<32x128xf32>
    %155 = arith.maximumf %153, %154 : vector<32x128xf32>
    %cst_54 = arith.constant dense<0.000000e+00> : vector<1x128xf32>
    %156 = tpu.matmul %22, %155, %cst_54 {dimension_numbers = #tpu.dot_dimension_numbers<[1], [0], [0], [1], [0, 0, 1, 1], [], []>} : vector<1x32xf32>, vector<32x128xf32>, vector<1x128xf32> -> vector<1x128xf32>
    %157 = vector.broadcast %23 : vector<1x1xf32> to vector<1x128xf32>
    %158 = arith.addf %156, %157 : vector<1x128xf32>
    %159 = arith.index_cast %c7_i32 : i32 to index
    %c0_55 = arith.constant 0 : index
    %160 = vector.load %arg12[%159, %c0_55] : memref<8x128xf32, #tpu.memory_space<vmem>>, vector<1x128xf32>
    tpu.vector_store %arg12[%159, %c0_55], %158 {strides = array<i32>} : memref<8x128xf32, #tpu.memory_space<vmem>>, vector<1x128xf32>,
    %c8_i32 = arith.constant 8 : i32
    return
  }
  func.func @transform_0(%arg0: i32) -> (i32, i32) {
    %c0_i32 = arith.constant 0 : i32
    %c0_i32_0 = arith.constant 0 : i32
    return %c0_i32, %arg0 : i32, i32
  }
  func.func @transform_1(%arg0: i32) -> (i32, i32) {
    %c0_i32 = arith.constant 0 : i32
    %c0_i32_0 = arith.constant 0 : i32
    return %c0_i32, %arg0 : i32, i32
  }
  func.func @transform_2(%arg0: i32) -> (i32, i32) {
    %c0_i32 = arith.constant 0 : i32
    %c0_i32_0 = arith.constant 0 : i32
    %c0_i32_1 = arith.constant 0 : i32
    return %c0_i32, %c0_i32_0 : i32, i32
  }
  func.func @transform_3(%arg0: i32) -> (i32, i32) {
    %c0_i32 = arith.constant 0 : i32
    %c0_i32_0 = arith.constant 0 : i32
    %c0_i32_1 = arith.constant 0 : i32
    return %c0_i32, %c0_i32_0 : i32, i32
  }
  func.func @transform_4(%arg0: i32) -> (i32, i32) {
    %c0_i32 = arith.constant 0 : i32
    %c0_i32_0 = arith.constant 0 : i32
    %c0_i32_1 = arith.constant 0 : i32
    return %c0_i32, %c0_i32_0 : i32, i32
  }
  func.func @transform_5(%arg0: i32) -> (i32, i32) {
    %c0_i32 = arith.constant 0 : i32
    %c0_i32_0 = arith.constant 0 : i32
    %c0_i32_1 = arith.constant 0 : i32
    return %c0_i32, %c0_i32_0 : i32, i32
  }
  func.func @transform_6(%arg0: i32) -> (i32, i32) {
    %c0_i32 = arith.constant 0 : i32
    %c0_i32_0 = arith.constant 0 : i32
    %c0_i32_1 = arith.constant 0 : i32
    return %c0_i32, %c0_i32_0 : i32, i32
  }
  func.func @transform_7(%arg0: i32) -> (i32, i32) {
    %c0_i32 = arith.constant 0 : i32
    %c0_i32_0 = arith.constant 0 : i32
    %c0_i32_1 = arith.constant 0 : i32
    return %c0_i32, %c0_i32_0 : i32, i32
  }
  func.func @transform_8(%arg0: i32) -> (i32, i32) {
    %c0_i32 = arith.constant 0 : i32
    %c0_i32_0 = arith.constant 0 : i32
    %c0_i32_1 = arith.constant 0 : i32
    return %c0_i32, %c0_i32_0 : i32, i32
  }
  func.func @transform_9(%arg0: i32) -> (i32, i32) {
    %c0_i32 = arith.constant 0 : i32
    %c0_i32_0 = arith.constant 0 : i32
    %c0_i32_1 = arith.constant 0 : i32
    return %c0_i32, %c0_i32_0 : i32, i32
  }
  func.func @transform_10(%arg0: i32) -> (i32, i32) {
    %c0_i32 = arith.constant 0 : i32
    %c0_i32_0 = arith.constant 0 : i32
    %c0_i32_1 = arith.constant 0 : i32
    return %c0_i32, %c0_i32_0 : i32, i32
  }
  func.func @transform_11(%arg0: i32) -> (i32, i32) {
    %c0_i32 = arith.constant 0 : i32
    %c0_i32_0 = arith.constant 0 : i32
    return %c0_i32, %arg0 : i32, i32
  }
}

</mosaic_0001>

<bundles_post_ra>
// kernel: partial_decoder_forward.1
= control target key start
LH: loop header
LB: loop body
LE: loop exit
PB: predicated region body
PF: predicated region fallthrough
CT: control target
= control target key end

     0   :  { %vm69_vm0 = vcmask 64512   ;;  %vm326_vm1 = vcmask 1043456   ;;  %v1515_v3 = vmov 0   ;;  %vm313_vm2 = vcmask 31744   ;;  %s1924_s2 = inlined_call_operand.vmem [shape: f32[8,8], index: 2, kind: input, shape index: {}]   ;;  %s1925_s3 = inlined_call_operand.vmem [shape: f32[32,8], index: 3, kind: input, shape index: {}]   ;;  %s1926_s0 = inlined_call_operand.vmem [shape: f32[4,128], index: 0, kind: input, shape index: {}]   ;;  %s1927_s4 = inlined_call_operand.vmem [shape: f32[32,1], index: 4, kind: input, shape index: {}]   ;;  %s1928_s6 = inlined_call_operand.vmem [shape: f32[32,4], index: 6, kind: input, shape index: {}]   ;;  %s1929_s7 = inlined_call_operand.vmem [shape: f32[32,1], index: 7, kind: input, shape index: {}]   ;;  %s1930_s8 = inlined_call_operand.vmem [shape: f32[32,1], index: 8, kind: input, shape index: {}]   ;;  %s1931_s5 = inlined_call_operand.vmem [shape: f32[32,32], index: 5, kind: input, shape index: {}]   ;;  %s1932_s10 = inlined_call_operand.<no memory space> [shape: f32[1,1], index: 10, kind: input, shape index: {}]   ;;  %s1933_s1 = inlined_call_operand.vmem [shape: f32[1,128], index: 1, kind: input, shape index: {}]   ;;  %s1934_s9 = inlined_call_operand.vmem [shape: f32[1,32], index: 9, kind: input, shape index: {}]   ;;  %s1935_s11 = inlined_call_operand.vmem [shape: f32[8,128], index: 11, kind: output, shape index: {}]  }
   0x1   :  { %v44_v0 = vld [vmem:[%s1924_s2] sm:$0xff]  ;;  %v41_v2 = vld [vmem:[%s1925_s3 + $0x8] sm:$0xff]  ;;  %1514 = vset.pattern.permute.xlu1 %v1515_v3  ;;  %1513 = vset.pattern.permute.xlu0 %v1515_v3  ;;  %v42_v4 = vld [vmem:[%s1925_s3 + $0x10] sm:$0xff]  ;;  %vm175_vm3 = vcmask 261120   ;;  %v16_v49 = vstv %s1932_s10  ;;  %v445_v50 = vlaneseq  ;;  %v1516_v52 = vmov 0.0  }
   0x2   :  { %v40_v1 = vld [vmem:[%s1925_s3] sm:$0xff]  ;;  %1335 = vmatprep.subr.mxu0 %v44_v0  ;;  %v47_v6 = vld [vmem:[%s1927_s4 + $0x10] sm:$0xff]  ;;  %v43_v7 = vld [vmem:[%s1925_s3 + $0x18] sm:$0xff]  ;;  %17 = vst [vmem:[#allocation2] sm:$0x1] %v16_v49  ;;  %vm1518_vm12 = vmmov 0  }
   0x3   :  { %1337 = vmatprep.mubr.msk.f32.mxu0 %vm69_vm0, %v40_v1  ;;  %v277_v5 = vld [vmem:[%s1926_s0] sm:$0xf]  ;;  %1336 = vmatpush3.msra.mxu0 %v44_v0  ;;  %v48_v10 = vld [vmem:[%s1927_s4 + $0x18] sm:$0xff]  ;;  %v46_v11 = vld [vmem:[%s1927_s4 + $0x8] sm:$0xff]  ;;  %v446_v51 = vand.u32 127, %v445_v50 }
   0x4   :  { %1338 = vmatmul.mubr.msk.f32.vlgmr.msra.gmra.mrb[0].mxu0 %vm69_vm0, %v41_v2  ;;  %1357 = vmatprep.subr.msk.mxu0 %vm326_vm1, %v277_v5  ;;  %v45_v8 = vld [vmem:[%s1927_s4] sm:$0xff]  ;;  %v274_v12 = vld [vmem:[%s1928_s6 + $0x8] sm:$0xff]  ;;  %v275_v13 = vld [vmem:[%s1928_s6 + $0x10] sm:$0xff] }
   0x5   :  { %1340 = vmatprep.mubr.msk.f32.mxu0 %vm69_vm0, %v42_v4  ;;  %1358 = vmatpush3.msk.msra.mxu0 %vm326_vm1, %v277_v5  ;;  %v273_v9 = vld [vmem:[%s1928_s6] sm:$0xff]  ;;  %v279_v15 = vld [vmem:[%s1929_s7 + $0x8] sm:$0xff]  ;;  %v276_v16 = vld [vmem:[%s1928_s6 + $0x18] sm:$0xff]  ;;  %vm557_vm4 = vcmp.eq.s32.totalorder %v446_v51, 1  ;;  %vm447_vm5 = vcmp.eq.s32.totalorder %v446_v51, 0  ;;  %vm753_vm6 = vcmp.eq.s32.totalorder %v446_v51, 3 }
   0x6   :  { %61 = vperm.xlu1 %1514, %v47_v6   ;;  %51 = vperm.xlu0 %1513, %v45_v8   ;;  %v278_v14 = vld [vmem:[%s1929_s7] sm:$0xff]  ;;  %v280_v17 = vld [vmem:[%s1929_s7 + $0x10] sm:$0xff]  ;;  %v281_v18 = vld [vmem:[%s1929_s7 + $0x18] sm:$0xff]  ;;  %vm655_vm7 = vcmp.eq.s32.totalorder %v446_v51, 2  ;;  %v1684_v53 = vsel %vm557_vm4, 1.0, %v1516_v52  ;;  %v1687_v54 = vsel %vm447_vm5, 1.0, %v1516_v52 }
   0x7   :  { %v415_v19 = vld [vmem:[%s1930_s8] sm:$0xff]  ;;  %v418_v20 = vld [vmem:[%s1930_s8 + $0x18] sm:$0xff]  ;;  %v416_v21 = vld [vmem:[%s1930_s8 + $0x8] sm:$0xff]  ;;  %v1690_v56 = vsel %vm753_vm6, 1.0, %v1516_v52  ;;  %v1693_v57 = vsel %vm655_vm7, 1.0, %v1516_v52  ;;  %vm851_vm8 = vcmp.eq.s32.totalorder %v446_v51, 4 }
   0x8   :  { %1341 = vmatmul.mubr.msk.f32.gmra.mrb[2].mxu0 %vm69_vm0, %v43_v7  ;;  %v417_v22 = vld [vmem:[%s1930_s8 + $0x10] sm:$0xff]  ;;  %v171_v23 = vld [vmem:[%s1931_s5] sm:$0xff]  ;;  %v172_v46 = vld [vmem:[%s1931_s5 + $0x8] sm:$0xff]  ;;  %v1704_v1 = vsel %vm851_vm8, 1.0, %v1516_v52  ;;  %vm949_vm9 = vcmp.eq.s32.totalorder %v446_v51, 5  ;;  %vm1047_vm10 = vcmp.eq.s32.totalorder %v446_v51, 6 }
   0x9   :  { %1359 = vmatprep.mubr.msk.f32.mxu0 %vm313_vm2, %v273_v9  ;;  %1351 = vmatprep.mubr.msk.f32.mxu1 %vm175_vm3, %v171_v23  ;;  %v173_v47 = vld [vmem:[%s1931_s5 + $0x10] sm:$0xff]  ;;  %v174_v48 = vld [vmem:[%s1931_s5 + $0x18] sm:$0xff]  ;;  %v1716_v8 = vsel %vm949_vm9, 1.0, %v1516_v52  ;;  %vm1145_vm11 = vcmp.eq.s32.totalorder %v446_v51, 7 }
   0xa   :  { %66 = vperm.xlu1 %1514, %v48_v10   ;;  %56 = vperm.xlu0 %1513, %v46_v11  }
   0xc   :  { %1360 = vmatmul.mubr.msk.f32.vlgmr.msra.gmra.mrb[4].mxu0 %vm313_vm2, %v274_v12 }
   0xd   :  { %1362 = vmatprep.mubr.msk.f32.mxu0 %vm313_vm2, %v275_v13  ;;  %v1724_v13 = vsel %vm1047_vm10, 1.0, %v1516_v52 }
   0xe   :  { %285 = vperm.xlu1 %1514, %v278_v14   ;;  %290 = vperm.xlu0 %1513, %v279_v15  }
  0x10   :  { %1363 = vmatmul.mubr.msk.f32.gmra.mrb[6].mxu0 %vm313_vm2, %v276_v16 }
  0x11   :  { %1384 = vmatprep.mubr.msk.f32.mxu0 %vm1518_vm12, %v1516_v52 }
  0x12   :  { %295 = vperm.xlu1 %1514, %v280_v17   ;;  %300 = vperm.xlu0 %1513, %v281_v18   ;;  %v1732_v18 = vsel %vm1145_vm11, 1.0, %v1516_v52 }
  0x16   :  { %421 = vperm.xlu1 %1514, %v415_v19   ;;  %436 = vperm.xlu0 %1513, %v418_v20  }
  0x1a   :  { %426 = vperm.xlu1 %1514, %v416_v21  }
  0x1e   :  { %431 = vperm.xlu1 %1514, %v417_v22  }
  0x85   :  { %v52_v24 = vpop.permute.xlu0 %51  ;;  %v62_v25 = vpop.permute.xlu1 %61 }
  0x89   :  { %v57_v26 = vpop.permute.xlu0 %56  ;;  %v67_v32 = vpop.permute.xlu1 %66 }
  0xd7   :  { %v1339_v27 = vpop.f32.mrb[0].mxu0 }
  0xd8   :  { %v154_v28 = vadd.f32 %v1339_v27, %v57_v26  ;;  %v148_v29 = vpop.f32.mrb[1].mxu0 }
  0xd9   :  { %v149_v30 = vadd.f32 %v148_v29, %v52_v24 }
  0xda   :  { %v168_v31 = vmax.f32 %v154_v28, 0.0 }
  0xdb   :  { %v167_v33 = vmax.f32 %v149_v30, 0.0  ;;  %v1342_v34 = vpop.f32.mrb[2].mxu0 }
  0xdc   :  { %v164_v35 = vadd.f32 %v1342_v34, %v67_v32  ;;  %v158_v36 = vpop.f32.mrb[3].mxu0 }
  0xdd   :  { %v159_v37 = vadd.f32 %v158_v36, %v62_v25  ;;  %v1453_v38 = vpack.c.bf16 %v168_v31, %v167_v33 }
  0xde   :  { %v170_v39 = vmax.f32 %v164_v35, 0.0 }
  0xdf   :  { %v169_v40 = vmax.f32 %v159_v37, 0.0  ;;  %1454 = vmatprep.subr.bf16.mxu1 %v1453_v38  ;;  %v1659_v41 = vpop.f32.mrb[4].mxu0 }
  0xe0   :  { %1456 = vmatpush3.bf16.msra.mxu1 %v1453_v38  ;;  %v1661_v42 = vpop.f32.mrb[5].mxu0 }
  0xe1   :  { %v1457_v43 = vpack.c.bf16 %v170_v39, %v169_v40 }
  0xe3   :  { %1458 = vmatprep.subr.bf16.mxu1 %v1457_v43  ;;  %v1663_v44 = vpop.f32.mrb[6].mxu0 }
  0xe4   :  { %1460 = vmatpush3.bf16.msra.mxu1 %v1457_v43  ;;  %v1665_v45 = vpop.f32.mrb[7].mxu0 }
  0xe7   :  { %1352 = vmatmul.mubr.msk.f32.vlgmr.msra.gmra.mrb[0].mxu1 %vm175_vm3, %v172_v46 }
  0xe8   :  { %1354 = vmatprep.mubr.msk.f32.mxu1 %vm175_vm3, %v173_v47 }
  0xeb   :  { %1355 = vmatmul.mubr.msk.f32.gmra.mrb[2].mxu1 %vm175_vm3, %v174_v48 }
  0xec   :  { %1373 = vmatprep.mubr.msk.f32.mxu1 %vm1518_vm12, %v1516_v52 }
 0x1ba   :  { %v1353_v55 = vpop.f32.mrb[0].mxu1 }
 0x1bb   :  { %v1695_v58 = vpop.f32.mrb[1].mxu1  ;;  %v561_v59 = vmul.f32 %v1353_v55, %v1684_v53  ;;  %v451_v60 = vmul.f32 %v1353_v55, %v1687_v54  ;;  %v757_v63 = vmul.f32 %v1353_v55, %v1690_v56  ;;  %v659_v0 = vmul.f32 %v1353_v55, %v1693_v57 }
 0x1bc   :  { %v855_v6 = vmul.f32 %v1353_v55, %v1704_v1  ;;  %v854_v7 = vmul.f32 %v1704_v1, %v1695_v58  ;;  %v953_v11 = vmul.f32 %v1353_v55, %v1716_v8  ;;  %v952_v12 = vmul.f32 %v1716_v8, %v1695_v58 }
 0x1bd   :  { %v567_v61 = vsel %vm69_vm0, %v561_v59, 0.0  ;;  %v457_v62 = vsel %vm69_vm0, %v451_v60, 0.0  ;;  %v763_v4 = vsel %vm69_vm0, %v757_v63, 0.0  ;;  %v665_v5 = vsel %vm69_vm0, %v659_v0, 0.0 }
 0x1be   :  { %568 = vadd.xlane.f32.xlu0 %v567_v61  ;;  %458 = vadd.xlane.f32.xlu1 %v457_v62  ;;  %v1706_v2 = vpop.f32.mrb[2].mxu1  ;;  %v861_v9 = vsel %vm69_vm0, %v855_v6, 0.0  ;;  %v858_v10 = vsel %vm69_vm0, %v854_v7, 0.0  ;;  %v959_v14 = vsel %vm69_vm0, %v953_v11, 0.0  ;;  %v956_v15 = vsel %vm69_vm0, %v952_v12, 0.0  ;;  %v291_v12 = vpop.permute.xlu0 %290 }
 0x1bf   :  { %v1708_v3 = vpop.f32.mrb[3].mxu1  ;;  %v1051_v16 = vmul.f32 %v1353_v55, %v1724_v13  ;;  %v1050_v17 = vmul.f32 %v1724_v13, %v1695_v58  ;;  %v1149_v21 = vmul.f32 %v1353_v55, %v1732_v18  ;;  %v1148_v22 = vmul.f32 %v1732_v18, %v1695_v58 }
 0x1c0   :  { %v452_v23 = vmul.f32 %v1687_v54, %v1708_v3  ;;  %v450_v26 = vmul.f32 %v1687_v54, %v1695_v58  ;;  %v562_v28 = vmul.f32 %v1684_v53, %v1708_v3  ;;  %v560_v30 = vmul.f32 %v1684_v53, %v1695_v58 }
 0x1c1   :  { %v1057_v19 = vsel %vm69_vm0, %v1051_v16, 0.0  ;;  %v1054_v20 = vsel %vm69_vm0, %v1050_v17, 0.0  ;;  %v1155_v24 = vsel %vm69_vm0, %v1149_v21, 0.0  ;;  %v1152_v25 = vsel %vm69_vm0, %v1148_v22, 0.0  ;;  %v1255_v17 = vld [vmem:[%s1933_s1] ss:$0 sm:$0xff] }
 0x1c2   :  { %764 = vadd.xlane.f32.xlu0 %v763_v4  ;;  %666 = vadd.xlane.f32.xlu1 %v665_v5  ;;  %v460_v27 = vsel %vm69_vm0, %v452_v23, 0.0  ;;  %v454_v29 = vsel %vm69_vm0, %v450_v26, 0.0  ;;  %v570_v31 = vsel %vm69_vm0, %v562_v28, 0.0  ;;  %v660_v32 = vmul.f32 %v1693_v57, %v1708_v3 }
 0x1c3   :  { %v564_v33 = vsel %vm69_vm0, %v560_v30, 0.0  ;;  %v658_v34 = vmul.f32 %v1693_v57, %v1695_v58  ;;  %v758_v36 = vmul.f32 %v1690_v56, %v1708_v3  ;;  %v756_v38 = vmul.f32 %v1690_v56, %v1695_v58 }
 0x1c4   :  { %v668_v35 = vsel %vm69_vm0, %v660_v32, 0.0  ;;  %v453_v40 = vmul.f32 %v1706_v2, %v1687_v54  ;;  %v856_v43 = vmul.f32 %v1704_v1, %v1708_v3  ;;  %v563_v49 = vmul.f32 %v1706_v2, %v1684_v53 }
 0x1c5   :  { %v662_v37 = vsel %vm69_vm0, %v658_v34, 0.0  ;;  %v766_v39 = vsel %vm69_vm0, %v758_v36, 0.0  ;;  %v760_v46 = vsel %vm69_vm0, %v756_v38, 0.0  ;;  %v954_v51 = vmul.f32 %v1716_v8, %v1708_v3 }
 0x1c6   :  { %862 = vadd.xlane.f32.xlu0 %v861_v9  ;;  %859 = vadd.xlane.f32.xlu1 %v858_v10  ;;  %v463_v47 = vsel %vm69_vm0, %v453_v40, 0.0  ;;  %v864_v48 = vsel %vm69_vm0, %v856_v43, 0.0  ;;  %v573_v54 = vsel %vm69_vm0, %v563_v49, 0.0  ;;  %v661_v58 = vmul.f32 %v1706_v2, %v1693_v57 }
 0x1c7   :  { %v962_v55 = vsel %vm69_vm0, %v954_v51, 0.0  ;;  %v1052_v59 = vmul.f32 %v1724_v13, %v1708_v3  ;;  %v759_v61 = vmul.f32 %v1706_v2, %v1690_v56  ;;  %v1150_v62 = vmul.f32 %v1732_v18, %v1708_v3 }
 0x1c8   :  { %v671_v60 = vsel %vm69_vm0, %v661_v58, 0.0  ;;  %v1517_v63 = vmov 0.0|0.0   ;;  %v857_v4 = vmul.f32 %v1706_v2, %v1704_v1  ;;  %v955_v3 = vmul.f32 %v1706_v2, %v1716_v8  ;;  %v444_v1 = vld [vmem:[#allocation2] sm:$0x1]  ;;  %v286_v8 = vpop.permute.xlu1 %285 }
 0x1c9   :  { %v1060_v53 = vsel %vm69_vm0, %v1052_v59, 0.0  ;;  %1461 = vmatprep.subr.bf16.mxu1 %v1517_v63  ;;  %1467 = vmatprep.subr.bf16.mxu0 %v1517_v63  ;;  %v769_v57 = vsel %vm69_vm0, %v759_v61, 0.0  ;;  %v1158_v0 = vsel %vm69_vm0, %v1150_v62, 0.0  ;;  %v1053_v6 = vmul.f32 %v1706_v2, %v1724_v13 }
 0x1ca   :  { %960 = vadd.xlane.f32.xlu0 %v959_v14  ;;  %957 = vadd.xlane.f32.xlu1 %v956_v15  ;;  %v867_v56 = vsel %vm69_vm0, %v857_v4, 0.0  ;;  %v965_v5 = vsel %vm69_vm0, %v955_v3, 0.0  ;;  %v1151_v9 = vmul.f32 %v1706_v2, %v1732_v18  ;;  %v301_v14 = vpop.permute.xlu0 %300  ;;  %v310_v21 = vmul.f32 %v1255_v17, %v291_v12 }
 0x1cb   :  { %v1063_v7 = vsel %vm69_vm0, %v1053_v6, 0.0 }
 0x1cc   :  { %v1161_v10 = vsel %vm69_vm0, %v1151_v9, 0.0  ;;  %v296_v11 = vpop.permute.xlu1 %295  ;;  %v402_v22 = vadd.f32 %v1659_v41, %v310_v21 }
 0x1ce   :  { %1058 = vadd.xlane.f32.xlu0 %v1057_v19  ;;  %1055 = vadd.xlane.f32.xlu1 %v1054_v20  ;;  %v1807_v2 = vpop.permute.xlu0 %436  ;;  %v309_v20 = vmul.f32 %v1255_v17, %v286_v8 }
 0x1d0   :  { %v422_v13 = vpop.permute.xlu1 %421  ;;  %v397_v23 = vadd.f32 %v1661_v42, %v309_v20 }
 0x1d2   :  { %1156 = vadd.xlane.f32.xlu0 %v1155_v24  ;;  %1153 = vadd.xlane.f32.xlu1 %v1152_v25 }
 0x1d4   :  { %v427_v15 = vpop.permute.xlu1 %426 }
 0x1d5   :  { %v440_v26 = vadd.f32 %v427_v15, %v402_v22 }
 0x1d6   :  { %455 = vadd.xlane.f32.xlu0 %v454_v29  ;;  %461 = vadd.xlane.f32.xlu1 %v460_v27  ;;  %v439_v27 = vadd.f32 %v422_v13, %v397_v23 }
 0x1d8   :  { %v1809_v16 = vpop.permute.xlu1 %431 }
 0x1da   :  { %565 = vadd.xlane.f32.xlu0 %v564_v33  ;;  %571 = vadd.xlane.f32.xlu1 %v570_v31 }
 0x1de   :  { %663 = vadd.xlane.f32.xlu0 %v662_v37  ;;  %669 = vadd.xlane.f32.xlu1 %v668_v35 }
 0x1e2   :  { %761 = vadd.xlane.f32.xlu0 %v760_v46  ;;  %767 = vadd.xlane.f32.xlu1 %v766_v39 }
 0x1e6   :  { %464 = vadd.xlane.f32.xlu0 %v463_v47  ;;  %865 = vadd.xlane.f32.xlu1 %v864_v48 }
 0x1ea   :  { %574 = vadd.xlane.f32.xlu0 %v573_v54  ;;  %963 = vadd.xlane.f32.xlu1 %v962_v55 }
 0x1ee   :  { %672 = vadd.xlane.f32.xlu0 %v671_v60  ;;  %1061 = vadd.xlane.f32.xlu1 %v1060_v53 }
 0x1f2   :  { %770 = vadd.xlane.f32.xlu0 %v769_v57  ;;  %1159 = vadd.xlane.f32.xlu1 %v1158_v0 }
 0x1f6   :  { %868 = vadd.xlane.f32.xlu0 %v867_v56 }
 0x1fa   :  { %966 = vadd.xlane.f32.xlu0 %v965_v5 }
 0x1fe   :  { %1064 = vadd.xlane.f32.xlu0 %v1063_v7 }
 0x202   :  { %1162 = vadd.xlane.f32.xlu0 %v1161_v10  ;;  %v311_v10 = vmul.f32 %v1255_v17, %v296_v11 }
 0x203   :  { %476 = vperm.xlu1 %1514, %v444_v1  }
 0x204   :  { %v407_v20 = vadd.f32 %v1665_v45, %v311_v10 }
 0x24b   :  { %v569_v18 = vpop.xlane.xlu0 %568  ;;  %v459_v19 = vpop.xlane.xlu1 %458 }
 0x24c   :  { %v467_v60 = vadd.f32 %v459_v19, %v440_v26  ;;  %v577_v56 = vadd.f32 %v569_v18, %v440_v26  ;;  %v312_v19 = vmul.f32 %v1255_v17, %v301_v14 }
 0x24e   :  { %v471_v3 = vmax.f32 %v467_v60, 0.0  ;;  %v581_v8 = vmax.f32 %v577_v56, 0.0  ;;  %v412_v23 = vadd.f32 %v1663_v44, %v312_v19 }
 0x24f   :  { %v765_v24 = vpop.xlane.xlu0 %764  ;;  %v667_v25 = vpop.xlane.xlu1 %666 }
 0x250   :  { %v675_v12 = vadd.f32 %v667_v25, %v440_v26  ;;  %v1829_v25 = vadd.f32 %v1809_v16, %v407_v20  ;;  %v1832_v14 = vadd.f32 %v1807_v2, %v412_v23 }
 0x253   :  { %v863_v28 = vpop.xlane.xlu0 %862  ;;  %v860_v29 = vpop.xlane.xlu1 %859 }
 0x254   :  { %v871_v30 = vadd.f32 %v863_v28, %v440_v26  ;;  %v870_v31 = vadd.f32 %v860_v29, %v439_v27  ;;  %v773_v28 = vadd.f32 %v765_v24, %v440_v26  ;;  %v679_v29 = vmax.f32 %v675_v12, 0.0 }
 0x256   :  { %v875_v32 = vmax.f32 %v871_v30, 0.0  ;;  %v874_v33 = vmax.f32 %v870_v31, 0.0  ;;  %v777_v45 = vmax.f32 %v773_v28, 0.0 }
 0x257   :  { %v961_v34 = vpop.xlane.xlu0 %960  ;;  %v958_v35 = vpop.xlane.xlu1 %957 }
 0x258   :  { %v1816_v36 = vpack.c.bf16 %v875_v32, %v874_v33  ;;  %v969_v37 = vadd.f32 %v961_v34, %v440_v26  ;;  %v968_v38 = vadd.f32 %v958_v35, %v439_v27 }
 0x25a   :  { %v973_v39 = vmax.f32 %v969_v37, 0.0  ;;  %v972_v41 = vmax.f32 %v968_v38, 0.0 }
 0x25b   :  { %v1059_v40 = vpop.xlane.xlu0 %1058  ;;  %v1056_v42 = vpop.xlane.xlu1 %1055 }
 0x25c   :  { %v1818_v43 = vpack.c.bf16 %v973_v39, %v972_v41  ;;  %v1067_v46 = vadd.f32 %v1059_v40, %v440_v26  ;;  %v1066_v47 = vadd.f32 %v1056_v42, %v439_v27 }
 0x25e   :  { %v1071_v48 = vmax.f32 %v1067_v46, 0.0  ;;  %v1070_v49 = vmax.f32 %v1066_v47, 0.0  ;;  %v1842_v46 = vld [vmem:[%s1934_s9] sm:$0x1] }
 0x25f   :  { %v1157_v51 = vpop.xlane.xlu0 %1156  ;;  %v1154_v54 = vpop.xlane.xlu1 %1153 }
 0x260   :  { %v1820_v55 = vpack.c.bf16 %v1071_v48, %v1070_v49  ;;  %v1165_v58 = vadd.f32 %v1157_v51, %v440_v26  ;;  %v1164_v59 = vadd.f32 %v1154_v54, %v439_v27 }
 0x262   :  { %v1169_v53 = vmax.f32 %v1165_v58, 0.0  ;;  %v1168_v61 = vmax.f32 %v1164_v59, 0.0 }
 0x263   :  { %v456_v62 = vpop.xlane.xlu0 %455  ;;  %v462_v57 = vpop.xlane.xlu1 %461 }
 0x264   :  { %v1822_v0 = vpack.c.bf16 %v1169_v53, %v1168_v61  ;;  %v466_v4 = vadd.f32 %v456_v62, %v439_v27  ;;  %v468_v17 = vadd.f32 %v462_v57, %v1829_v25 }
 0x266   :  { %v470_v5 = vmax.f32 %v466_v4, 0.0  ;;  %v472_v35 = vmax.f32 %v468_v17, 0.0 }
 0x267   :  { %v566_v6 = vpop.xlane.xlu0 %565  ;;  %v572_v7 = vpop.xlane.xlu1 %571 }
 0x268   :  { %v1462_v9 = vpack.c.bf16 %v471_v3, %v470_v5  ;;  %v576_v1 = vadd.f32 %v566_v6, %v439_v27  ;;  %v578_v37 = vadd.f32 %v572_v7, %v1829_v25 }
 0x26a   :  { %v580_v13 = vmax.f32 %v576_v1, 0.0  ;;  %1463 = vmatpush3.bf16.msra.mxu1 %v1462_v9  ;;  %v582_v2 = vmax.f32 %v578_v37, 0.0 }
 0x26b   :  { %v664_v15 = vpop.xlane.xlu0 %663  ;;  %1464 = vmatprep.subr.bf16.mxu1 %v1517_v63  ;;  %v670_v18 = vpop.xlane.xlu1 %669 }
 0x26c   :  { %v1468_v21 = vpack.c.bf16 %v581_v8, %v580_v13  ;;  %v674_v22 = vadd.f32 %v664_v15, %v439_v27  ;;  %v676_v40 = vadd.f32 %v670_v18, %v1829_v25 }
 0x26e   :  { %v678_v30 = vmax.f32 %v674_v22, 0.0  ;;  %1469 = vmatpush3.bf16.msra.mxu0 %v1468_v21  ;;  %v680_v51 = vmax.f32 %v676_v40, 0.0 }
 0x26f   :  { %v762_v11 = vpop.xlane.xlu0 %761  ;;  %1470 = vmatprep.subr.bf16.mxu0 %v1517_v63  ;;  %v768_v44 = vpop.xlane.xlu1 %767 }
 0x270   :  { %v1474_v31 = vpack.c.bf16 %v679_v29, %v678_v30  ;;  %v772_v32 = vadd.f32 %v762_v11, %v439_v27  ;;  %v774_v54 = vadd.f32 %v768_v44, %v1829_v25 }
 0x272   :  { %v776_v33 = vmax.f32 %v772_v32, 0.0  ;;  %v778_v62 = vmax.f32 %v774_v54, 0.0 }
 0x273   :  { %v465_v24 = vpop.xlane.xlu0 %464  ;;  %v866_v41 = vpop.xlane.xlu1 %865 }
 0x274   :  { %v1480_v26 = vpack.c.bf16 %v777_v45, %v776_v33  ;;  %v469_v34 = vadd.f32 %v465_v24, %v1832_v14  ;;  %v872_v57 = vadd.f32 %v866_v41, %v1829_v25 }
 0x276   :  { %v473_v38 = vmax.f32 %v469_v34, 0.0  ;;  %v876_v7 = vmax.f32 %v872_v57, 0.0 }
 0x277   :  { %v575_v16 = vpop.xlane.xlu0 %574  ;;  %v964_v59 = vpop.xlane.xlu1 %963 }
 0x278   :  { %v1465_v39 = vpack.c.bf16 %v473_v38, %v472_v35  ;;  %v579_v27 = vadd.f32 %v575_v16, %v1832_v14  ;;  %v970_v9 = vadd.f32 %v964_v59, %v1829_v25 }
 0x27a   :  { %v583_v42 = vmax.f32 %v579_v27, 0.0  ;;  %1466 = vmatpush3.bf16.msra.mxu1 %v1465_v39  ;;  %v974_v13 = vmax.f32 %v970_v9, 0.0 }
 0x27b   :  { %v673_v47 = vpop.xlane.xlu0 %672  ;;  %1473 = vmatprep.subr.bf16.mxu1 %v1517_v63  ;;  %v1062_v6 = vpop.xlane.xlu1 %1061 }
 0x27c   :  { %v1471_v48 = vpack.c.bf16 %v583_v42, %v582_v2  ;;  %v677_v49 = vadd.f32 %v673_v47, %v1832_v14  ;;  %v1068_v15 = vadd.f32 %v1062_v6, %v1829_v25 }
 0x27d   :  { %1374 = vmatmul.mubr.msk.f32.vlgmr.msra.gmra.mrb[4].mxu1 %vm175_vm3, %v1842_v46 }
 0x27e   :  { %v681_v58 = vmax.f32 %v677_v49, 0.0  ;;  %1472 = vmatpush3.bf16.msra.mxu0 %v1471_v48  ;;  %1475 = vmatpush3.bf16.msra.mxu1 %v1474_v31  ;;  %v1072_v18 = vmax.f32 %v1068_v15, 0.0  ;;  %v480_v31 = vshrl.u32 %v445_v50, 7 }
 0x27f   :  { %v771_v60 = vpop.xlane.xlu0 %770  ;;  %1476 = vmatprep.subr.bf16.mxu1 %v1517_v63  ;;  %1479 = vmatprep.subr.bf16.mxu0 %v1517_v63 }
 0x280   :  { %v1477_v53 = vpack.c.bf16 %v681_v58, %v680_v51  ;;  %v775_v61 = vadd.f32 %v771_v60, %v1832_v14  ;;  %1395 = vmatprep.mubr.msk.f32.mxu1 %vm1518_vm12, %v1516_v52  ;;  %v481_v32 = vsub.s32 0, %v480_v31 }
 0x281   :  { %1385 = vmatmul.mubr.msk.f32.vlgmr.msra.gmra.mrb[8].mxu0 %vm175_vm3, %v1842_v46 }
 0x282   :  { %v779_v4 = vmax.f32 %v775_v61, 0.0  ;;  %1478 = vmatpush3.bf16.msra.mxu1 %v1477_v53  ;;  %1481 = vmatpush3.bf16.msra.mxu0 %v1480_v26 }
 0x283   :  { %v869_v56 = vpop.xlane.xlu0 %868  ;;  %1482 = vmatprep.subr.bf16.mxu0 %v1517_v63  ;;  %1485 = vmatprep.subr.bf16.mxu1 %v1517_v63 }
 0x284   :  { %v1483_v3 = vpack.c.bf16 %v779_v4, %v778_v62  ;;  %v873_v5 = vadd.f32 %v869_v56, %v1832_v14  ;;  %1406 = vmatprep.mubr.msk.f32.mxu0 %vm1518_vm12, %v1516_v52 }
 0x285   :  { %1396 = vmatmul.mubr.msk.f32.vlgmr.msra.gmra.mrb[6].mxu1 %vm175_vm3, %v1842_v46 }
 0x286   :  { %v877_v1 = vmax.f32 %v873_v5, 0.0  ;;  %1484 = vmatpush3.bf16.msra.mxu0 %v1483_v3  ;;  %1487 = vmatpush3.bf16.msra.mxu1 %v1816_v36  ;;  %v1160_v36 = vpop.xlane.xlu1 %1159 }
 0x287   :  { %v967_v10 = vpop.xlane.xlu0 %966  ;;  %1488 = vmatprep.subr.bf16.mxu1 %v1517_v63  ;;  %1491 = vmatprep.subr.bf16.mxu0 %v1517_v63  ;;  %v1166_v23 = vadd.f32 %v1160_v36, %v1829_v25 }
 0x288   :  { %v1489_v8 = vpack.c.bf16 %v877_v1, %v876_v7  ;;  %v971_v12 = vadd.f32 %v967_v10, %v1832_v14  ;;  %1417 = vmatprep.mubr.msk.f32.mxu1 %vm1518_vm12, %v1516_v52 }
 0x289   :  { %1407 = vmatmul.mubr.msk.f32.vlgmr.msra.gmra.mrb[10].mxu0 %vm175_vm3, %v1842_v46  ;;  %v1170_v11 = vmax.f32 %v1166_v23, 0.0 }
 0x28a   :  { %v975_v19 = vmax.f32 %v971_v12, 0.0  ;;  %1490 = vmatpush3.bf16.msra.mxu1 %v1489_v8  ;;  %1493 = vmatpush3.bf16.msra.mxu0 %v1818_v43 }
 0x28b   :  { %v1065_v20 = vpop.xlane.xlu0 %1064  ;;  %1494 = vmatprep.subr.bf16.mxu0 %v1517_v63  ;;  %1497 = vmatprep.subr.bf16.mxu1 %v1517_v63 }
 0x28c   :  { %v1495_v21 = vpack.c.bf16 %v975_v19, %v974_v13  ;;  %v1069_v22 = vadd.f32 %v1065_v20, %v1832_v14  ;;  %1428 = vmatprep.mubr.msk.f32.mxu0 %vm1518_vm12, %v1516_v52 }
 0x28d   :  { %1418 = vmatmul.mubr.msk.f32.vlgmr.msra.gmra.mrb[8].mxu1 %vm175_vm3, %v1842_v46 }
 0x28e   :  { %v1073_v28 = vmax.f32 %v1069_v22, 0.0  ;;  %1496 = vmatpush3.bf16.msra.mxu0 %v1495_v21  ;;  %1499 = vmatpush3.bf16.msra.mxu1 %v1820_v55 }
 0x28f   :  { %v1163_v43 = vpop.xlane.xlu0 %1162  ;;  %1500 = vmatprep.subr.bf16.mxu1 %v1517_v63  ;;  %1503 = vmatprep.subr.bf16.mxu0 %v1517_v63 }
 0x290   :  { %v1501_v29 = vpack.c.bf16 %v1073_v28, %v1072_v18  ;;  %v1167_v30 = vadd.f32 %v1163_v43, %v1832_v14  ;;  %1439 = vmatprep.mubr.msk.f32.mxu1 %vm1518_vm12, %v1516_v52  ;;  %v477_v14 = vpop.permute.xlu1 %476 }
 0x291   :  { %1429 = vmatmul.mubr.msk.f32.vlgmr.msra.gmra.mrb[12].mxu0 %vm175_vm3, %v1842_v46  ;;  %v482_v45 = vrot.slane %v477_v14, %v481_v32 }
 0x292   :  { %v1171_v25 = vmax.f32 %v1167_v30, 0.0  ;;  %1502 = vmatpush3.bf16.msra.mxu1 %v1501_v29  ;;  %1505 = vmatpush3.bf16.msra.mxu0 %v1822_v0 }
 0x293   :  { %1506 = vmatprep.subr.bf16.mxu0 %v1517_v63  ;;  %1450 = vmatprep.mubr.msk.f32.mxu0 %vm1518_vm12, %v1516_v52 }
 0x294   :  { %v1507_v55 = vpack.c.bf16 %v1171_v25, %v1170_v11 }
 0x295   :  { %1440 = vmatmul.mubr.msk.f32.vlgmr.msra.gmra.mrb[10].mxu1 %vm175_vm3, %v1842_v46 }
 0x296   :  { %1508 = vmatpush3.bf16.msra.mxu0 %v1507_v55 }
 0x299   :  { %1451 = vmatmul.mubr.msk.f32.vlgmr.msra.gmra.mrb[14].mxu0 %vm175_vm3, %v1842_v46 }
 0x350   :  { %v552_v17 = vpop.f32.mrb[4].mxu1 }
 0x351   :  { %v553_v0 = vadd.f32 %v552_v17, %v482_v45  ;;  %v1375_v33 = vpop.f32.mrb[5].mxu1 }
 0x353   :  { %556 = vst [vmem:[%s1935_s11] sm:$0x1] %v553_v0 }
 0x354   :  { %v650_v52 = vpop.f32.mrb[8].mxu0 }
 0x355   :  { %v651_v63 = vadd.f32 %v650_v52, %v482_v45  ;;  %v1386_v44 = vpop.f32.mrb[9].mxu0 }
 0x357   :  { %654 = vst [vmem:[%s1935_s11 + $0x1] sm:$0x1] %v651_v63 }
 0x358   :  { %v748_v24 = vpop.f32.mrb[6].mxu1 }
 0x359   :  { %v749_v26 = vadd.f32 %v748_v24, %v482_v45  ;;  %v1397_v50 = vpop.f32.mrb[7].mxu1 }
 0x35b   :  { %752 = vst [vmem:[%s1935_s11 + $0x2] sm:$0x1] %v749_v26 }
 0x35c   :  { %v846_v34 = vpop.f32.mrb[10].mxu0 }
 0x35d   :  { %v847_v35 = vadd.f32 %v846_v34, %v482_v45  ;;  %v1408_v37 = vpop.f32.mrb[11].mxu0 }
 0x35f   :  { %850 = vst [vmem:[%s1935_s11 + $0x3] sm:$0x1] %v847_v35 }
 0x360   :  { %v944_v38 = vpop.f32.mrb[8].mxu1 }
 0x361   :  { %v945_v16 = vadd.f32 %v944_v38, %v482_v45  ;;  %v1419_v39 = vpop.f32.mrb[9].mxu1 }
 0x363   :  { %948 = vst [vmem:[%s1935_s11 + $0x4] sm:$0x1] %v945_v16 }
 0x364   :  { %v1042_v27 = vpop.f32.mrb[12].mxu0 }
 0x365   :  { %v1043_v41 = vadd.f32 %v1042_v27, %v482_v45  ;;  %v1430_v2 = vpop.f32.mrb[13].mxu0 }
 0x367   :  { %1046 = vst [vmem:[%s1935_s11 + $0x5] sm:$0x1] %v1043_v41 }
 0x368   :  { %v1140_v40 = vpop.f32.mrb[10].mxu1 }
 0x369   :  { %v1141_v42 = vadd.f32 %v1140_v40, %v482_v45  ;;  %v1441_v46 = vpop.f32.mrb[11].mxu1 }
 0x36b   :  { %1144 = vst [vmem:[%s1935_s11 + $0x6] sm:$0x1] %v1141_v42 }
 0x36c   :  { %v1238_v47 = vpop.f32.mrb[14].mxu0 }
 0x36d   :  { %v1239_v48 = vadd.f32 %v1238_v47, %v482_v45  ;;  %v1452_v49 = vpop.f32.mrb[15].mxu0 }
 0x36f   :  { %1242 = vst [vmem:[%s1935_s11 + $0x7] sm:$0x1] %v1239_v48 }

</bundles_post_ra>
